<compile_context>
chip_gen: v7x
topology: tpu7x:2x2x1
jax: 0.10.0
libtpu: 0.0.40
codegen_flags: <defaults>
</compile_context>

<pallas_src>
import jax
import jax.numpy as jnp
from jax.experimental import pallas as pl
from jax.experimental.pallas import tpu as pltpu

IN_FEATURES = 1024
OUT_FEATURES = 4
PADDED_OUT = 128          # lane-dense compute width (full vreg lane dim)
NEG_PAD = -1e30           # drives padded logits to ~-inf before the softmax (safe in f32)


def classification_kernel(x_ref, w_ref, b_ref, o_ref):
    # x_ref: (tm, 1024), w_ref: (1024, 128), b_ref: (1, 128), o_ref: (tm, 4)
    z = jnp.dot(x_ref[...], w_ref[...], preferred_element_type=jnp.float32)
    z = z + b_ref[...]                                    # broadcast bias over rows
    # Stable log_softmax.  Padded lanes carry bias NEG_PAD, so they never win
    # the row max and exp(shifted) underflows to exactly 0 for them; the
    # log-sum-exp therefore only sees the 4 real classes.
    m = jnp.max(z, axis=-1, keepdims=True)
    shifted = z - m
    lse = jnp.log(jnp.sum(jnp.exp(shifted), axis=-1, keepdims=True))
    # Narrow store: only the 4 real classes go back to HBM.
    o_ref[...] = (shifted - lse)[:, :OUT_FEATURES].astype(o_ref.dtype)


def prepare_params(w_t, b):
    """Pad Linear params to the lane-dense compute width once, outside the hot path.

    w_t: (1024, 4) f32 (already transposed: x @ w_t + b), b: (4,) f32.
    Returns w_pad: (1024, 128), b_pad: (1, 128).
    """
    w_pad = jnp.zeros((IN_FEATURES, PADDED_OUT), jnp.float32)
    w_pad = w_pad.at[:, :OUT_FEATURES].set(w_t.astype(jnp.float32))
    b_pad = jnp.full((1, PADDED_OUT), NEG_PAD, jnp.float32)
    b_pad = b_pad.at[0, :OUT_FEATURES].set(b.astype(jnp.float32))
    return w_pad, b_pad


def _pick_tm(batch, tm):
    """Row-tile size: big enough to amortize per-step overhead, small enough for
    VMEM, and (when possible) giving >=2 grid steps for v7x megacore."""
    b8 = ((batch + 7) // 8) * 8
    tm = 2048 if tm is None else int(tm)
    tm = max(8, min(tm, 4096))
    tm -= tm % 8
    tm = min(tm, b8)                       # never allocate a block bigger than the batch
    if b8 > 8 and -(-b8 // tm) < 2:        # prefer >= 2 grid steps (both TCs on v7x)
        tm = max(8, ((-(-b8 // 2)) + 7) // 8 * 8)
    return tm


def classification_forward(x, w_pad, b_pad, *, tm=None):
    """x: [B, 1024] f32, w_pad: [1024, 128], b_pad: [1, 128] -> [B, 4] f32 log-probs."""
    B = x.shape[0]
    tm = _pick_tm(B, tm)
    grid = pl.cdiv(B, tm)

    # Explicit scoped-VMEM limit sized from the actual footprint (double-buffered
    # x + out tiles, resident weights/bias) plus headroom; clamped so it stays
    # inside v7x's 64 MiB physical VMEM and above every generation's default.
    est = (2 * tm * IN_FEATURES * 4          # x double-buffer
           + 2 * tm * OUT_FEATURES * 4       # out double-buffer
           + 2 * IN_FEATURES * PADDED_OUT * 4  # weights
           + 2 * PADDED_OUT * 4)             # bias
    vmem_limit = max(16 << 20, min(48 << 20, est + (8 << 20)))

    out = pl.pallas_call(
        classification_kernel,
        out_shape=jax.ShapeDtypeStruct((B, OUT_FEATURES), jnp.float32),
        grid_spec=pltpu.PrefetchScalarGridSpec(
            num_scalar_prefetch=0,
            grid=(grid,),
            in_specs=[
                pl.BlockSpec((tm, IN_FEATURES), lambda i: (i, 0)),
                pl.BlockSpec((IN_FEATURES, PADDED_OUT), lambda i: (0, 0)),
                pl.BlockSpec((1, PADDED_OUT), lambda i: (0, 0)),
            ],
            out_specs=pl.BlockSpec((tm, OUT_FEATURES), lambda i: (i, 0)),
        ),
        compiler_params=pltpu.CompilerParams(
            dimension_semantics=("parallel",),
            vmem_limit_bytes=int(vmem_limit),
        ),
    )(x, w_pad, b_pad)

    return out


def init_params(key):
    # Deterministic init mirroring nn.Linear defaults: U(-1/sqrt(in), 1/sqrt(in)).
    kw, kb = jax.random.split(key)
    bound = 1.0 / jnp.sqrt(jnp.float32(IN_FEATURES))
    w_t = jax.random.uniform(
        kw, (IN_FEATURES, OUT_FEATURES), jnp.float32, minval=-bound, maxval=bound
    )
    b = jax.random.uniform(
        kb, (OUT_FEATURES,), jnp.float32, minval=-bound, maxval=bound
    )
    return w_t, b


if __name__ == "__main__":
    key = jax.random.PRNGKey(0)
    kx, kp = jax.random.split(key)
    w_t, b = init_params(kp)
    w_pad, b_pad = prepare_params(w_t, b)   # padded once, reused across calls

    # Small primary check (B multiple of 8).
    B = 8
    x = jax.random.normal(kx, (B, IN_FEATURES), dtype=jnp.float32)
    out = jax.block_until_ready(classification_forward(x, w_pad, b_pad))
    ref = jax.nn.log_softmax(x @ w_t + b, axis=1)
    assert out.shape == (B, OUT_FEATURES)
    assert jnp.allclose(out, ref, atol=1e-5, rtol=1e-5)

    # Ragged batch (B not a multiple of 8): exercises the partial last block.
    B2 = 6
    x2 = x[:B2]
    out2 = jax.block_until_ready(classification_forward(x2, w_pad, b_pad))
    ref2 = jax.nn.log_softmax(x2 @ w_t + b, axis=1)
    assert out2.shape == (B2, OUT_FEATURES)
    assert jnp.allclose(out2, ref2, atol=1e-5, rtol=1e-5)

    # Multi-step grid (>=2 blocks, ragged tail): exercises the megacore split path.
    B3 = 18
    x3 = jax.random.normal(jax.random.PRNGKey(1), (B3, IN_FEATURES), dtype=jnp.float32)
    out3 = jax.block_until_ready(classification_forward(x3, w_pad, b_pad))
    ref3 = jax.nn.log_softmax(x3 @ w_t + b, axis=1)
    assert out3.shape == (B3, OUT_FEATURES)
    assert jnp.allclose(out3, ref3, atol=1e-5, rtol=1e-5)

    print("KERNEL_OK")
</pallas_src>

<mosaic_0001>
module attributes {stable_mosaic.version = 11 : i64} {
  func.func @classification_kernel(%arg0: i32, %arg1: memref<8x1024xf32, #tpu.memory_space<vmem>>, %arg2: memref<1024x128xf32, #tpu.memory_space<vmem>>, %arg3: memref<1x128xf32, #tpu.memory_space<vmem>>, %arg4: memref<8x4xf32, #tpu.memory_space<vmem>>) attributes {dimension_semantics = [#tpu.dimension_semantics<parallel>], iteration_bounds = array<i64: 1>, scalar_prefetch = 0 : i64, scratch_operands = 0 : i64, tpu.core_type = #tpu.core_type<tc>, window_params = [{transform_indices = @transform_0, window_bounds = array<i64: 8, 1024>}, {pipeline_mode = #tpu.pipeline_mode<synchronous>, transform_indices = @transform_1, window_bounds = array<i64: 1024, 128>}, {pipeline_mode = #tpu.pipeline_mode<synchronous>, transform_indices = @transform_2, window_bounds = array<i64: 1, 128>}, {transform_indices = @transform_3, window_bounds = array<i64: 8, 4>}]} {
    %c0 = arith.constant 0 : index
    %c0_0 = arith.constant 0 : index
    %0 = vector.load %arg1[%c0, %c0_0] : memref<8x1024xf32, #tpu.memory_space<vmem>>, vector<8x1024xf32>
    %c0_1 = arith.constant 0 : index
    %c0_2 = arith.constant 0 : index
    %1 = vector.load %arg2[%c0_1, %c0_2] : memref<1024x128xf32, #tpu.memory_space<vmem>>, vector<1024x128xf32>
    %cst = arith.constant dense<0.000000e+00> : vector<8x128xf32>
    %2 = tpu.matmul %0, %1, %cst {dimension_numbers = #tpu.dot_dimension_numbers<[1], [0], [0], [1], [0, 0, 1, 1], [], []>} : vector<8x1024xf32>, vector<1024x128xf32>, vector<8x128xf32> -> vector<8x128xf32>
    %c0_3 = arith.constant 0 : index
    %c0_4 = arith.constant 0 : index
    %3 = vector.load %arg3[%c0_3, %c0_4] : memref<1x128xf32, #tpu.memory_space<vmem>>, vector<1x128xf32>
    %4 = vector.broadcast %3 : vector<1x128xf32> to vector<8x128xf32>
    %5 = arith.addf %2, %4 : vector<8x128xf32>
    %cst_5 = arith.constant dense<0xFF800000> : vector<8xf32>
    %6 = vector.multi_reduction <maximumf>, %5, %cst_5 [1] : vector<8x128xf32> to vector<8xf32>
    %7 = vector.shape_cast %6 : vector<8xf32> to vector<8x1xf32>
    %8 = vector.broadcast %7 : vector<8x1xf32> to vector<8x128xf32>
    %9 = arith.subf %5, %8 : vector<8x128xf32>
    %10 = math.exp %9 : vector<8x128xf32>
    %cst_6 = arith.constant dense<0.000000e+00> : vector<8xf32>
    %11 = vector.multi_reduction <add>, %10, %cst_6 [1] : vector<8x128xf32> to vector<8xf32>
    %12 = vector.shape_cast %11 : vector<8xf32> to vector<8x1xf32>
    %13 = math.log %12 : vector<8x1xf32>
    %14 = vector.broadcast %13 : vector<8x1xf32> to vector<8x128xf32>
    %15 = arith.subf %9, %14 : vector<8x128xf32>
    %16 = vector.extract_strided_slice %15 {offsets = [0, 0], sizes = [8, 4], strides = [1, 1]} : vector<8x128xf32> to vector<8x4xf32>
    %c0_7 = arith.constant 0 : index
    %c0_8 = arith.constant 0 : index
    %17 = vector.load %arg4[%c0_7, %c0_8] : memref<8x4xf32, #tpu.memory_space<vmem>>, vector<8x4xf32>
    tpu.vector_store %arg4[%c0_7, %c0_8], %16 {strides = array<i32>} : memref<8x4xf32, #tpu.memory_space<vmem>>, vector<8x4xf32>,
    return
  }
  func.func @transform_0(%arg0: i32) -> (i32, i32) {
    %c0_i32 = arith.constant 0 : i32
    %c0_i32_0 = arith.constant 0 : i32
    return %arg0, %c0_i32 : i32, i32
  }
  func.func @transform_1(%arg0: i32) -> (i32, i32) {
    %c0_i32 = arith.constant 0 : i32
    %c0_i32_0 = arith.constant 0 : i32
    %c0_i32_1 = arith.constant 0 : i32
    return %c0_i32, %c0_i32_0 : i32, i32
  }
  func.func @transform_2(%arg0: i32) -> (i32, i32) {
    %c0_i32 = arith.constant 0 : i32
    %c0_i32_0 = arith.constant 0 : i32
    %c0_i32_1 = arith.constant 0 : i32
    return %c0_i32, %c0_i32_0 : i32, i32
  }
  func.func @transform_3(%arg0: i32) -> (i32, i32) {
    %c0_i32 = arith.constant 0 : i32
    %c0_i32_0 = arith.constant 0 : i32
    return %arg0, %c0_i32 : i32, i32
  }
}

</mosaic_0001>

<bundles_post_ra>
// kernel: tpu_custom_call.1
= control target key start
LH: loop header
LB: loop body
LE: loop exit
PB: predicated region body
PF: predicated region fallthrough
CT: control target
= control target key end

     0   :  { %8 = vsyncpa [#allocation3], 0  ;;  %s867_s0 = inlined_call_operand.hbm [shape: f32[8,1024], index: 0, kind: input, shape index: {}]   ;;  %s868_s1 = inlined_call_operand.hbm [shape: f32[1024,128], index: 1, kind: input, shape index: {}]   ;;  %s869_s2 = inlined_call_operand.vmem [shape: f32[1,128], index: 2, kind: input, shape index: {}]   ;;  %s870_s3 = inlined_call_operand.vmem [shape: f32[8,4], index: 3, kind: output, shape index: {}]  }
   0x1   :  { %9 = vsyncpa [#allocation5], 0  ;;  %s806_s12 = smov [#allocation2]   ;;  %s807_s14 = smov [#allocation4]  }
   0x2   :  { %s16_s13 = sshll.u32 %s806_s12, 4  ;;  %s25_s15 = sshll.u32 %s807_s14, 4  ;;  %s17_s13 = int_to_ptr.vmem [resolvable:$true] %s16_s13  ;;  %s830_s15 = int_to_ptr.vmem [resolvable:$true] %s25_s15 }
   0x3   :  { %s758_s18 = scalar_lea.hbm %s867_s0, 1024 }
   0x4   :  { %p759_p0 = scmp.ne.s32.totalorder %s867_s0, %s758_s18  ;;  %p762_p1 = scmp.lt.u32.totalorder %s758_s18, %s867_s0 }
   0x6   :  { %p764_p2 = pnand %p762_p1, %p759_p0 }
   0x8   :  { %767 = shalt.err (!%p764_p2)
}
   0x9   :  { %s768_s23 = scalar_lea.vmem %s17_s13, 1024  ;;  %p773_p4 = scmp.lt.s32.totalorder %s17_s13, %s17_s13 }
   0xa   :  { %p769_p3 = scmp.ne.s32.totalorder %s17_s13, %s768_s23  ;;  %p774_p5 = scmp.lt.s32.totalorder %s768_s23, %s768_s23 }
   0xc   :  { %p775_p6 = por %p774_p5, %p773_p4 }
   0xe   :  { %p776_p7 = pnand %p775_p6, %p769_p3 }
  0x10   :  { %779 = shalt.err (!%p776_p7)
}
  0x11   :  { %19 = dma.hbm_to_vmem [thread:$0]  %s867_s0, 1024, %s17_s13, [#allocation3]  }
  0x12   :  { %s780_s28 = scalar_lea.hbm %s868_s1, 16384 }
  0x13   :  { %p781_p8 = scmp.ne.s32.totalorder %s868_s1, %s780_s28  ;;  %p784_p9 = scmp.lt.u32.totalorder %s780_s28, %s868_s1 }
  0x15   :  { %p786_p10 = pnand %p784_p9, %p781_p8 }
  0x17   :  { %789 = shalt.err (!%p786_p10)
}
  0x18   :  { %s790_s6 = scalar_lea.vmem %s830_s15, 16384  ;;  %p795_p12 = scmp.lt.s32.totalorder %s830_s15, %s830_s15 }
  0x19   :  { %p791_p11 = scmp.ne.s32.totalorder %s830_s15, %s790_s6  ;;  %p796_p13 = scmp.lt.s32.totalorder %s790_s6, %s790_s6 }
  0x1b   :  { %p797_p0 = por %p796_p13, %p795_p12 }
  0x1d   :  { %p798_p1 = pnand %p797_p0, %p791_p11 }
  0x1f   :  { %801 = shalt.err (!%p798_p1)
}
  0x20   :  { %s808_s0 = smov 128   ;;  %s809_s7 = smov 8  }
  0x21   :  { %31 = dma.hbm_to_vmem [thread:$0]  %s868_s1, 16384, %s830_s15, [#allocation5], %s808_s0, %s808_s0, %s809_s7  }
  0x22   :  { %802 = dma.done.wait [#allocation3], 1024  }
  0x23   :  { %803 = vsyncadd [#allocation3], 4294966272 }
  0x24   :  { %804 = dma.done.wait [#allocation5], 16384  }
  0x25   :  { %805 = vsyncadd [#allocation5], 4294950912  ;;  %v64_v0 = vld [vmem:[#allocation4 + $0x80] sm:$0xff]  ;;  %v65_v1 = vld [vmem:[#allocation4 + $0x88] sm:$0xff]  ;;  %vm473_vm0 = vcmask 31744  }
  0x26   :  { %v48_v2 = vld [vmem:[#allocation4] sm:$0xff]  ;;  %v622_v3 = vpack.c.bf16 %v65_v1, %v64_v0  ;;  %v49_v4 = vld [vmem:[#allocation4 + $0x8] sm:$0xff]  ;;  %v66_v11 = vld [vmem:[#allocation4 + $0x90] sm:$0xff] }
  0x27   :  { %v96_v5 = vld [vmem:[#allocation4 + $0x180] sm:$0xff]  ;;  %v97_v6 = vld [vmem:[#allocation4 + $0x188] sm:$0xff]  ;;  %v624_v7 = vpack.c.bf16 %v49_v4, %v48_v2  ;;  %v67_v13 = vld [vmem:[#allocation4 + $0x98] sm:$0xff] }
  0x28   :  { %v654_v8 = vpack.c.bf16 %v97_v6, %v96_v5  ;;  %v80_v9 = vld [vmem:[#allocation4 + $0x100] sm:$0xff]  ;;  %v81_v10 = vld [vmem:[#allocation4 + $0x108] sm:$0xff]  ;;  %623 = vmatprep.subr.bf16.mxu0 %v622_v3  ;;  %v50_v14 = vld [vmem:[#allocation4 + $0x10] sm:$0xff]  ;;  %v626_v16 = vpack.c.bf16 %v67_v13, %v66_v11 }
  0x29   :  { %v656_v12 = vpack.c.bf16 %v81_v10, %v80_v9  ;;  %v51_v15 = vld [vmem:[#allocation4 + $0x18] sm:$0xff]  ;;  %625 = vmatpush3.bf16.msra.mxu0 %v624_v7  ;;  %v98_v18 = vld [vmem:[#allocation4 + $0x190] sm:$0xff]  ;;  %v68_v23 = vld [vmem:[#allocation4 + $0xa0] sm:$0xff] }
  0x2a   :  { %655 = vmatprep.subr.bf16.mxu1 %v654_v8  ;;  %v628_v17 = vpack.c.bf16 %v51_v15, %v50_v14  ;;  %v99_v19 = vld [vmem:[#allocation4 + $0x198] sm:$0xff]  ;;  %v82_v20 = vld [vmem:[#allocation4 + $0x110] sm:$0xff]  ;;  %v69_v24 = vld [vmem:[#allocation4 + $0xa8] sm:$0xff]  ;;  %627 = vmatprep.subr.bf16.mxu0 %v626_v16 }
  0x2b   :  { %657 = vmatpush3.bf16.msra.mxu1 %v656_v12  ;;  %v658_v21 = vpack.c.bf16 %v99_v19, %v98_v18  ;;  %v83_v22 = vld [vmem:[#allocation4 + $0x118] sm:$0xff]  ;;  %v630_v26 = vpack.c.bf16 %v69_v24, %v68_v23  ;;  %v52_v27 = vld [vmem:[#allocation4 + $0x20] sm:$0xff]  ;;  %v53_v28 = vld [vmem:[#allocation4 + $0x28] sm:$0xff] }
  0x2c   :  { %v660_v25 = vpack.c.bf16 %v83_v22, %v82_v20  ;;  %v100_v29 = vld [vmem:[#allocation4 + $0x1a0] sm:$0xff]  ;;  %v101_v30 = vld [vmem:[#allocation4 + $0x1a8] sm:$0xff]  ;;  %v632_v33 = vpack.c.bf16 %v53_v28, %v52_v27  ;;  %v70_v35 = vld [vmem:[#allocation4 + $0xb0] sm:$0xff] }
  0x2d   :  { %659 = vmatprep.subr.bf16.mxu1 %v658_v21  ;;  %v84_v31 = vld [vmem:[#allocation4 + $0x120] sm:$0xff]  ;;  %v85_v32 = vld [vmem:[#allocation4 + $0x128] sm:$0xff]  ;;  %629 = vmatpush3.bf16.msra.mxu0 %v628_v17  ;;  %v662_v34 = vpack.c.bf16 %v101_v30, %v100_v29  ;;  %v71_v36 = vld [vmem:[#allocation4 + $0xb8] sm:$0xff] }
  0x2e   :  { %v54_v37 = vld [vmem:[#allocation4 + $0x30] sm:$0xff]  ;;  %631 = vmatprep.subr.bf16.mxu0 %v630_v26  ;;  %v664_v38 = vpack.c.bf16 %v85_v32, %v84_v31  ;;  %v634_v39 = vpack.c.bf16 %v71_v36, %v70_v35  ;;  %v55_v40 = vld [vmem:[#allocation4 + $0x38] sm:$0xff]  ;;  %v72_v46 = vld [vmem:[#allocation4 + $0xc0] sm:$0xff] }
  0x2f   :  { %661 = vmatpush3.bf16.msra.mxu1 %v660_v25  ;;  %v102_v41 = vld [vmem:[#allocation4 + $0x1b0] sm:$0xff]  ;;  %v103_v42 = vld [vmem:[#allocation4 + $0x1b8] sm:$0xff]  ;;  %v73_v47 = vld [vmem:[#allocation4 + $0xc8] sm:$0xff]  ;;  %v636_v48 = vpack.c.bf16 %v55_v40, %v54_v37 }
  0x30   :  { %663 = vmatprep.subr.bf16.mxu1 %v662_v34  ;;  %v666_v43 = vpack.c.bf16 %v103_v42, %v102_v41  ;;  %v86_v44 = vld [vmem:[#allocation4 + $0x130] sm:$0xff]  ;;  %v87_v45 = vld [vmem:[#allocation4 + $0x138] sm:$0xff]  ;;  %v104_v49 = vld [vmem:[#allocation4 + $0x1c0] sm:$0xff]  ;;  %v638_v52 = vpack.c.bf16 %v73_v47, %v72_v46 }
  0x31   :  { %633 = vmatpush3.bf16.msra.mxu0 %v632_v33  ;;  %v105_v50 = vld [vmem:[#allocation4 + $0x1c8] sm:$0xff]  ;;  %v668_v51 = vpack.c.bf16 %v87_v45, %v86_v44  ;;  %v56_v53 = vld [vmem:[#allocation4 + $0x40] sm:$0xff]  ;;  %v74_v58 = vld [vmem:[#allocation4 + $0xd0] sm:$0xff] }
  0x32   :  { %635 = vmatprep.subr.bf16.mxu0 %v634_v39  ;;  %v57_v54 = vld [vmem:[#allocation4 + $0x48] sm:$0xff]  ;;  %v88_v55 = vld [vmem:[#allocation4 + $0x140] sm:$0xff]  ;;  %v670_v56 = vpack.c.bf16 %v105_v50, %v104_v49  ;;  %v75_v59 = vld [vmem:[#allocation4 + $0xd8] sm:$0xff] }
  0x33   :  { %665 = vmatpush3.bf16.msra.mxu1 %v664_v38  ;;  %v89_v57 = vld [vmem:[#allocation4 + $0x148] sm:$0xff]  ;;  %v106_v60 = vld [vmem:[#allocation4 + $0x1d0] sm:$0xff]  ;;  %v107_v61 = vld [vmem:[#allocation4 + $0x1d8] sm:$0xff]  ;;  %v640_v62 = vpack.c.bf16 %v57_v54, %v56_v53  ;;  %v642_v0 = vpack.c.bf16 %v75_v59, %v74_v58 }
  0x34   :  { %667 = vmatprep.subr.bf16.mxu1 %v666_v43  ;;  %v672_v63 = vpack.c.bf16 %v89_v57, %v88_v55  ;;  %v58_v1 = vld [vmem:[#allocation4 + $0x50] sm:$0xff]  ;;  %v59_v2 = vld [vmem:[#allocation4 + $0x58] sm:$0xff]  ;;  %v674_v4 = vpack.c.bf16 %v107_v61, %v106_v60  ;;  %v76_v6 = vld [vmem:[#allocation4 + $0xe0] sm:$0xff] }
  0x35   :  { %637 = vmatpush3.bf16.msra.mxu0 %v636_v48  ;;  %v90_v3 = vld [vmem:[#allocation4 + $0x150] sm:$0xff]  ;;  %v91_v5 = vld [vmem:[#allocation4 + $0x158] sm:$0xff]  ;;  %v77_v7 = vld [vmem:[#allocation4 + $0xe8] sm:$0xff]  ;;  %v644_v10 = vpack.c.bf16 %v59_v2, %v58_v1 }
  0x36   :  { %639 = vmatprep.subr.bf16.mxu0 %v638_v52  ;;  %v108_v8 = vld [vmem:[#allocation4 + $0x1e0] sm:$0xff]  ;;  %v109_v9 = vld [vmem:[#allocation4 + $0x1e8] sm:$0xff]  ;;  %v676_v13 = vpack.c.bf16 %v91_v5, %v90_v3  ;;  %v646_v14 = vpack.c.bf16 %v77_v7, %v76_v6  ;;  %v78_v19 = vld [vmem:[#allocation4 + $0xf0] sm:$0xff] }
  0x37   :  { %669 = vmatpush3.bf16.msra.mxu1 %v668_v51  ;;  %v60_v11 = vld [vmem:[#allocation4 + $0x60] sm:$0xff]  ;;  %v61_v12 = vld [vmem:[#allocation4 + $0x68] sm:$0xff]  ;;  %v678_v18 = vpack.c.bf16 %v109_v9, %v108_v8  ;;  %v79_v20 = vld [vmem:[#allocation4 + $0xf8] sm:$0xff] }
  0x38   :  { %671 = vmatprep.subr.bf16.mxu1 %v670_v56  ;;  %v92_v15 = vld [vmem:[#allocation4 + $0x160] sm:$0xff]  ;;  %v93_v16 = vld [vmem:[#allocation4 + $0x168] sm:$0xff]  ;;  %v43_v21 = vld [vmem:[#allocation2 + $0x18] sm:$0xff]  ;;  %v648_v24 = vpack.c.bf16 %v61_v12, %v60_v11  ;;  %v650_v26 = vpack.c.bf16 %v79_v20, %v78_v19 }
  0x39   :  { %641 = vmatpush3.bf16.msra.mxu0 %v640_v62  ;;  %v41_v17 = vld [vmem:[#allocation2 + $0x8] sm:$0xff]  ;;  %v110_v22 = vld [vmem:[#allocation4 + $0x1f0] sm:$0xff]  ;;  %v111_v23 = vld [vmem:[#allocation4 + $0x1f8] sm:$0xff]  ;;  %317 = vmatprep.mubr.f32.mxu1 %v43_v21  ;;  %v680_v25 = vpack.c.bf16 %v93_v16, %v92_v15 }
  0x3a   :  { %643 = vmatprep.subr.bf16.mxu0 %v642_v0  ;;  %247 = vmatprep.mubr.f32.mxu0 %v41_v17  ;;  %v62_v27 = vld [vmem:[#allocation4 + $0x70] sm:$0xff]  ;;  %v63_v28 = vld [vmem:[#allocation4 + $0x78] sm:$0xff]  ;;  %v682_v30 = vpack.c.bf16 %v111_v23, %v110_v22  ;;  %v128_v32 = vld [vmem:[#allocation4 + $0x280] sm:$0xff] }
  0x3b   :  { %673 = vmatpush3.bf16.msra.mxu1 %v672_v63  ;;  %v94_v29 = vld [vmem:[#allocation4 + $0x170] sm:$0xff]  ;;  %v95_v31 = vld [vmem:[#allocation4 + $0x178] sm:$0xff]  ;;  %v129_v33 = vld [vmem:[#allocation4 + $0x288] sm:$0xff]  ;;  %v652_v36 = vpack.c.bf16 %v63_v28, %v62_v27 }
  0x3c   :  { %675 = vmatprep.subr.bf16.mxu1 %v674_v4  ;;  %v160_v34 = vld [vmem:[#allocation4 + $0x380] sm:$0xff]  ;;  %v161_v35 = vld [vmem:[#allocation4 + $0x388] sm:$0xff]  ;;  %v684_v37 = vpack.c.bf16 %v95_v31, %v94_v29  ;;  %v686_v38 = vpack.c.bf16 %v129_v33, %v128_v32  ;;  %v130_v44 = vld [vmem:[#allocation4 + $0x290] sm:$0xff] }
  0x3d   :  { %645 = vmatpush3.bf16.msra.mxu0 %v644_v10  ;;  %v112_v39 = vld [vmem:[#allocation4 + $0x200] sm:$0xff]  ;;  %v113_v40 = vld [vmem:[#allocation4 + $0x208] sm:$0xff]  ;;  %v718_v42 = vpack.c.bf16 %v161_v35, %v160_v34  ;;  %v131_v45 = vld [vmem:[#allocation4 + $0x298] sm:$0xff] }
  0x3e   :  { %647 = vmatprep.subr.bf16.mxu0 %v646_v14  ;;  %v144_v41 = vld [vmem:[#allocation4 + $0x300] sm:$0xff]  ;;  %v145_v43 = vld [vmem:[#allocation4 + $0x308] sm:$0xff]  ;;  %v162_v46 = vld [vmem:[#allocation4 + $0x390] sm:$0xff]  ;;  %v688_v49 = vpack.c.bf16 %v113_v40, %v112_v39  ;;  %v690_v52 = vpack.c.bf16 %v131_v45, %v130_v44 }
  0x3f   :  { %677 = vmatpush3.bf16.msra.mxu1 %v676_v13  ;;  %v163_v47 = vld [vmem:[#allocation4 + $0x398] sm:$0xff]  ;;  %v40_v48 = vld [vmem:[#allocation2] sm:$0xff]  ;;  %v42_v50 = vld [vmem:[#allocation2 + $0x10] sm:$0xff]  ;;  %v720_v51 = vpack.c.bf16 %v145_v43, %v144_v41 }
  0x40   :  { %679 = vmatprep.subr.bf16.mxu1 %v678_v18  ;;  %v114_v53 = vld [vmem:[#allocation4 + $0x210] sm:$0xff]  ;;  %v115_v54 = vld [vmem:[#allocation4 + $0x218] sm:$0xff]  ;;  %v722_v56 = vpack.c.bf16 %v163_v47, %v162_v46  ;;  %v132_v58 = vld [vmem:[#allocation4 + $0x2a0] sm:$0xff] }
  0x41   :  { %649 = vmatpush3.bf16.msra.mxu0 %v648_v24  ;;  %v146_v55 = vld [vmem:[#allocation4 + $0x310] sm:$0xff]  ;;  %v147_v57 = vld [vmem:[#allocation4 + $0x318] sm:$0xff]  ;;  %v133_v59 = vld [vmem:[#allocation4 + $0x2a8] sm:$0xff]  ;;  %v692_v62 = vpack.c.bf16 %v115_v54, %v114_v53 }
  0x42   :  { %651 = vmatprep.subr.bf16.mxu0 %v650_v26  ;;  %v164_v60 = vld [vmem:[#allocation4 + $0x3a0] sm:$0xff]  ;;  %v165_v61 = vld [vmem:[#allocation4 + $0x3a8] sm:$0xff]  ;;  %v724_v63 = vpack.c.bf16 %v147_v57, %v146_v55  ;;  %v694_v0 = vpack.c.bf16 %v133_v59, %v132_v58  ;;  %v134_v6 = vld [vmem:[#allocation4 + $0x2b0] sm:$0xff] }
  0x43   :  { %681 = vmatpush3.bf16.msra.mxu1 %v680_v25  ;;  %v116_v1 = vld [vmem:[#allocation4 + $0x220] sm:$0xff]  ;;  %v117_v2 = vld [vmem:[#allocation4 + $0x228] sm:$0xff]  ;;  %v726_v4 = vpack.c.bf16 %v165_v61, %v164_v60  ;;  %v135_v7 = vld [vmem:[#allocation4 + $0x2b8] sm:$0xff] }
  0x44   :  { %683 = vmatprep.subr.bf16.mxu1 %v682_v30  ;;  %v148_v3 = vld [vmem:[#allocation4 + $0x320] sm:$0xff]  ;;  %v149_v5 = vld [vmem:[#allocation4 + $0x328] sm:$0xff]  ;;  %v166_v8 = vld [vmem:[#allocation4 + $0x3b0] sm:$0xff]  ;;  %v696_v10 = vpack.c.bf16 %v117_v2, %v116_v1  ;;  %v698_v12 = vpack.c.bf16 %v135_v7, %v134_v6 }
  0x45   :  { %653 = vmatpush3.bf16.msra.mxu0 %v652_v36  ;;  %v167_v9 = vld [vmem:[#allocation4 + $0x3b8] sm:$0xff]  ;;  %v728_v11 = vpack.c.bf16 %v149_v5, %v148_v3  ;;  %v118_v13 = vld [vmem:[#allocation4 + $0x230] sm:$0xff]  ;;  %v136_v18 = vld [vmem:[#allocation4 + $0x2c0] sm:$0xff] }
  0x46   :  { %687 = vmatprep.subr.bf16.mxu0 %v686_v38  ;;  %v119_v14 = vld [vmem:[#allocation4 + $0x238] sm:$0xff]  ;;  %v150_v15 = vld [vmem:[#allocation4 + $0x330] sm:$0xff]  ;;  %v730_v16 = vpack.c.bf16 %v167_v9, %v166_v8  ;;  %v137_v19 = vld [vmem:[#allocation4 + $0x2c8] sm:$0xff] }
  0x47   :  { %685 = vmatpush3.bf16.msra.mxu1 %v684_v37  ;;  %v151_v17 = vld [vmem:[#allocation4 + $0x338] sm:$0xff]  ;;  %v168_v20 = vld [vmem:[#allocation4 + $0x3c0] sm:$0xff]  ;;  %v169_v21 = vld [vmem:[#allocation4 + $0x3c8] sm:$0xff]  ;;  %v700_v22 = vpack.c.bf16 %v119_v14, %v118_v13  ;;  %v702_v26 = vpack.c.bf16 %v137_v19, %v136_v18 }
  0x48   :  { %719 = vmatprep.subr.bf16.mxu1 %v718_v42  ;;  %248 = vmatmul.mubr.f32.vlgmr.msra.gmra.mrb[0].mxu0 %v40_v48  ;;  %v45_v23 = vld [vmem:[#allocation2 + $0x28] sm:$0xff]  ;;  %v47_v24 = vld [vmem:[#allocation2 + $0x38] sm:$0xff]  ;;  %v732_v25 = vpack.c.bf16 %v151_v17, %v150_v15  ;;  %v120_v27 = vld [vmem:[#allocation4 + $0x240] sm:$0xff]  ;;  %v734_v30 = vpack.c.bf16 %v169_v21, %v168_v20 }
  0x49   :  { %689 = vmatpush3.bf16.msra.mxu0 %v688_v49  ;;  %v121_v28 = vld [vmem:[#allocation4 + $0x248] sm:$0xff]  ;;  %v152_v29 = vld [vmem:[#allocation4 + $0x340] sm:$0xff]  ;;  %v138_v32 = vld [vmem:[#allocation4 + $0x2d0] sm:$0xff]  ;;  %387 = vmatprep.mubr.f32.mxu0 %v45_v23 }
  0x4a   :  { %318 = vmatmul.mubr.f32.vlgmr.msra.gmra.mrb[0].mxu1 %v42_v50  ;;  %691 = vmatprep.subr.bf16.mxu0 %v690_v52  ;;  %v153_v31 = vld [vmem:[#allocation4 + $0x348] sm:$0xff]  ;;  %v139_v33 = vld [vmem:[#allocation4 + $0x2d8] sm:$0xff]  ;;  %v170_v34 = vld [vmem:[#allocation4 + $0x3d0] sm:$0xff]  ;;  %v704_v36 = vpack.c.bf16 %v121_v28, %v120_v27 }
  0x4b   :  { %721 = vmatpush3.bf16.msra.mxu1 %v720_v51  ;;  %v171_v35 = vld [vmem:[#allocation4 + $0x3d8] sm:$0xff]  ;;  %457 = vmatprep.mubr.f32.mxu1 %v47_v24  ;;  %v736_v37 = vpack.c.bf16 %v153_v31, %v152_v29  ;;  %v706_v38 = vpack.c.bf16 %v139_v33, %v138_v32  ;;  %v122_v39 = vld [vmem:[#allocation4 + $0x250] sm:$0xff]  ;;  %v140_v44 = vld [vmem:[#allocation4 + $0x2e0] sm:$0xff] }
  0x4c   :  { %723 = vmatprep.subr.bf16.mxu1 %v722_v56  ;;  %v123_v40 = vld [vmem:[#allocation4 + $0x258] sm:$0xff]  ;;  %v154_v41 = vld [vmem:[#allocation4 + $0x350] sm:$0xff]  ;;  %v738_v42 = vpack.c.bf16 %v171_v35, %v170_v34  ;;  %v141_v45 = vld [vmem:[#allocation4 + $0x2e8] sm:$0xff] }
  0x4d   :  { %693 = vmatpush3.bf16.msra.mxu0 %v692_v62  ;;  %v155_v43 = vld [vmem:[#allocation4 + $0x358] sm:$0xff]  ;;  %v172_v46 = vld [vmem:[#allocation4 + $0x3e0] sm:$0xff]  ;;  %v173_v47 = vld [vmem:[#allocation4 + $0x3e8] sm:$0xff]  ;;  %v708_v48 = vpack.c.bf16 %v123_v40, %v122_v39  ;;  %v710_v50 = vpack.c.bf16 %v141_v45, %v140_v44 }
  0x4e   :  { %695 = vmatprep.subr.bf16.mxu0 %v694_v0  ;;  %v740_v49 = vpack.c.bf16 %v155_v43, %v154_v41  ;;  %v124_v51 = vld [vmem:[#allocation4 + $0x260] sm:$0xff]  ;;  %v125_v52 = vld [vmem:[#allocation4 + $0x268] sm:$0xff]  ;;  %v742_v54 = vpack.c.bf16 %v173_v47, %v172_v46  ;;  %v142_v56 = vld [vmem:[#allocation4 + $0x2f0] sm:$0xff] }
  0x4f   :  { %725 = vmatpush3.bf16.msra.mxu1 %v724_v63  ;;  %v156_v53 = vld [vmem:[#allocation4 + $0x360] sm:$0xff]  ;;  %v157_v55 = vld [vmem:[#allocation4 + $0x368] sm:$0xff]  ;;  %v143_v57 = vld [vmem:[#allocation4 + $0x2f8] sm:$0xff]  ;;  %v712_v60 = vpack.c.bf16 %v125_v52, %v124_v51 }
  0x50   :  { %727 = vmatprep.subr.bf16.mxu1 %v726_v4  ;;  %v174_v58 = vld [vmem:[#allocation4 + $0x3f0] sm:$0xff]  ;;  %v175_v59 = vld [vmem:[#allocation4 + $0x3f8] sm:$0xff]  ;;  %v744_v61 = vpack.c.bf16 %v157_v55, %v156_v53  ;;  %v714_v62 = vpack.c.bf16 %v143_v57, %v142_v56  ;;  %v44_v6 = vld [vmem:[#allocation2 + $0x20] sm:$0xff] }
  0x51   :  { %697 = vmatpush3.bf16.msra.mxu0 %v696_v10  ;;  %v126_v63 = vld [vmem:[#allocation4 + $0x270] sm:$0xff]  ;;  %v127_v0 = vld [vmem:[#allocation4 + $0x278] sm:$0xff]  ;;  %v746_v1 = vpack.c.bf16 %v175_v59, %v174_v58  ;;  %v481_v9 = vld [vmem:[%s869_s2] ss:$0 sm:$0xff] }
  0x52   :  { %699 = vmatprep.subr.bf16.mxu0 %v698_v12  ;;  %v158_v2 = vld [vmem:[#allocation4 + $0x370] sm:$0xff]  ;;  %v159_v3 = vld [vmem:[#allocation4 + $0x378] sm:$0xff]  ;;  %v716_v4 = vpack.c.bf16 %v127_v0, %v126_v63 }
  0x53   :  { %729 = vmatpush3.bf16.msra.mxu1 %v728_v11  ;;  %v748_v5 = vpack.c.bf16 %v159_v3, %v158_v2  ;;  %v46_v7 = vld [vmem:[#allocation2 + $0x30] sm:$0xff] }
  0x54   :  { %731 = vmatprep.subr.bf16.mxu1 %v730_v16 }
  0x55   :  { %701 = vmatpush3.bf16.msra.mxu0 %v700_v22 }
  0x56   :  { %703 = vmatprep.subr.bf16.mxu0 %v702_v26 }
  0x57   :  { %733 = vmatpush3.bf16.msra.mxu1 %v732_v25 }
  0x58   :  { %735 = vmatprep.subr.bf16.mxu1 %v734_v30 }
  0x59   :  { %705 = vmatpush3.bf16.msra.mxu0 %v704_v36 }
  0x5a   :  { %707 = vmatprep.subr.bf16.mxu0 %v706_v38 }
  0x5b   :  { %737 = vmatpush3.bf16.msra.mxu1 %v736_v37 }
  0x5c   :  { %739 = vmatprep.subr.bf16.mxu1 %v738_v42 }
  0x5d   :  { %709 = vmatpush3.bf16.msra.mxu0 %v708_v48 }
  0x5e   :  { %711 = vmatprep.subr.bf16.mxu0 %v710_v50 }
  0x5f   :  { %741 = vmatpush3.bf16.msra.mxu1 %v740_v49 }
  0x60   :  { %743 = vmatprep.subr.bf16.mxu1 %v742_v54 }
  0x61   :  { %713 = vmatpush3.bf16.msra.mxu0 %v712_v60 }
  0x62   :  { %715 = vmatprep.subr.bf16.mxu0 %v714_v62 }
  0x63   :  { %745 = vmatpush3.bf16.msra.mxu1 %v744_v61 }
  0x64   :  { %747 = vmatprep.subr.bf16.mxu1 %v746_v1 }
  0x65   :  { %717 = vmatpush3.bf16.msra.mxu0 %v716_v4 }
  0x67   :  { %749 = vmatpush3.bf16.msra.mxu1 %v748_v5 }
  0x68   :  { %388 = vmatmul.mubr.f32.vlgmr.msra.gmra.mrb[2].mxu0 %v44_v6 }
  0x6a   :  { %458 = vmatmul.mubr.f32.vlgmr.msra.gmra.mrb[2].mxu1 %v46_v7 }
 0x11b   :  { %v514_v8 = vpop.f32.mrb[0].mxu0 }
 0x11c   :  { %v515_v10 = vpop.f32.mrb[1].mxu0 }
 0x11d   :  { %v549_v11 = vpop.f32.mrb[0].mxu1  ;;  %v516_v12 = vadd.f32 %v515_v10, %v514_v8 }
 0x11e   :  { %v550_v13 = vpop.f32.mrb[1].mxu1 }
 0x11f   :  { %v551_v14 = vadd.f32 %v550_v13, %v549_v11  ;;  %v250_v15 = vadd.f32 %v516_v12, %v481_v9 }
 0x121   :  { %v320_v16 = vadd.f32 %v551_v14, %v250_v15 }
 0x13b   :  { %v584_v17 = vpop.f32.mrb[2].mxu0 }
 0x13c   :  { %v585_v18 = vpop.f32.mrb[3].mxu0 }
 0x13d   :  { %v619_v19 = vpop.f32.mrb[2].mxu1  ;;  %v586_v20 = vadd.f32 %v585_v18, %v584_v17 }
 0x13e   :  { %v620_v21 = vpop.f32.mrb[3].mxu1 }
 0x13f   :  { %v621_v22 = vadd.f32 %v620_v21, %v619_v19  ;;  %v390_v23 = vadd.f32 %v586_v20, %v320_v16 }
 0x141   :  { %v460_v24 = vadd.f32 %v621_v22, %v390_v23 }
 0x143   :  { %463 = vmax.xlane.f32.xlu0 %v460_v24 }
 0x1d0   :  { %v464_v25 = vpop.xlane.xlu0 %463 }
 0x1d1   :  { %v465_v26 = vsub.f32 %v460_v24, %v464_v25 }
 0x1d3   :  { %v466_v27 = vmul.f32 1.442695, %v465_v26 }
 0x1d5   :  { %754 = vpow2.f32 %v466_v27 }
 0x1df   :  { %v755_v28 = vpop.eup %754 }
 0x1e0   :  { %468 = vadd.xlane.f32.xlu0 %v755_v28 }
 0x26d   :  { %v469_v29 = vpop.xlane.xlu0 %468 }
 0x26e   :  { %756 = vlog2.f32 %v469_v29 }
 0x278   :  { %v757_v30 = vpop.eup %756 }
 0x279   :  { %v471_v31 = vmul.f32 0.6931472, %v757_v30 }
 0x27b   :  { %v472_v32 = vsub.f32 %v465_v26, %v471_v31 }
 0x27d   :  { %474 = vst.msk [vmem:[%s870_s3] sm:$0xff] %vm473_vm0, %v472_v32 }
 0x27e   :  { %479 = vsyncpa [#allocation3], 1 }
 0x27f   :  { %480 = vsyncpa [#allocation5], 1 }

</bundles_post_ra>
